<compile_context>
chip_gen: v5e
topology: v5e:2x2
jax: 0.10.0
libtpu: 0.0.40
codegen_flags: <defaults>
</compile_context>

<pallas_src>
import numpy as np
import jax
import jax.numpy as jnp
from jax.experimental import pallas as pl
from jax.experimental.pallas import tpu as pltpu


# --------------------------------------------------------------------------------------
# Pallas kernel: tiled per-sample remap (matmul) + intensity + cutout mask
# --------------------------------------------------------------------------------------
def _augment_kernel(params_ref, x_ref, s_ref, mask_ref, out_ref, acc_ref):
    b = pl.program_id(0)
    k = pl.program_id(2)

    @pl.when(k == 0)
    def _():
        acc_ref[...] = jnp.zeros_like(acc_ref)

    # (C, TK) @ (TK, TN) -> (C, TN)  : flip+crop+affine+roll as one sampling matmul tile.
    # x and S arrive as bf16 (cast once in the wrapper); accumulate in f32 on the MXU.
    acc_ref[...] += jnp.dot(
        x_ref[0],
        s_ref[0],
        preferred_element_type=jnp.float32,
    )

    @pl.when(k == pl.num_programs(2) - 1)
    def _():
        scale = params_ref[3 * b + 0]     # contrast factor (or 1.0)
        offset = params_ref[3 * b + 1]    # brightness offset (or 0.0)
        do_clip = params_ref[3 * b + 2]   # 1.0 if an intensity op was applied (kornia clamps)
        y = acc_ref[...] * scale + offset
        y = jnp.where(do_clip > 0.5, jnp.clip(y, 0.0, 1.0), y)
        y = y * mask_ref[...]             # SameCutout mask (all ones if not selected)
        out_ref[0] = y.astype(out_ref.dtype)


def _round_up(v, m):
    return ((v + m - 1) // m) * m


def _pick_tiles(HW, HoWo, tk_target, tn_target):
    # Lane-dense, (8,128)-aligned tiles.  With the default targets the S working set is
    # tk*tn*2B ~= 2 MiB per buffer (~4 MiB double-buffered) -- comfortably inside every
    # chip's scoped VMEM while being big enough to amortize the ~0.35 us per-grid-step
    # overhead.
    howo_pad = _round_up(HoWo, 128)
    tn = min(tn_target, howo_pad)
    howo_pad = _round_up(howo_pad, tn)
    hw_pad = _round_up(HW, 128)
    tk = min(tk_target, hw_pad)
    hw_pad = _round_up(hw_pad, tk)
    return hw_pad, howo_pad, tk, tn


def run_kornia_augs(x, params_flat, S, mask, out_hw, *, tk_target=512, tn_target=2048):
    B, C, H, W = x.shape
    HW = H * W
    Ho, Wo = out_hw
    HoWo = Ho * Wo

    hw_pad, howo_pad, tk, tn = _pick_tiles(HW, HoWo, tk_target, tn_target)
    n_j = howo_pad // tn
    n_k = hw_pad // tk

    x_flat = x.reshape(B, C, HW)
    if hw_pad != HW:
        x_flat = jnp.pad(x_flat, ((0, 0), (0, 0), (0, hw_pad - HW)))
    x_flat = x_flat.astype(jnp.bfloat16)     # halves x HBM traffic, no in-kernel cast

    S_p = S
    if hw_pad != HW or howo_pad != HoWo:
        S_p = jnp.pad(S_p, ((0, 0), (0, hw_pad - HW), (0, howo_pad - HoWo)))
    S_p = S_p.astype(jnp.bfloat16)           # halves the dominant HBM stream

    mask_p = mask
    if howo_pad != HoWo:
        mask_p = jnp.pad(mask_p, ((0, 0), (0, howo_pad - HoWo)), constant_values=1.0)

    cost = pl.CostEstimate(
        flops=2 * B * C * hw_pad * howo_pad,
        transcendentals=0,
        bytes_accessed=int(
            B * hw_pad * howo_pad * 2          # S (bf16), streamed once
            + B * C * hw_pad * 2 * n_j         # x (bf16), re-streamed per output tile
            + B * C * howo_pad * 4             # output (f32)
            + howo_pad * 4                     # mask
        ),
    )

    out = pl.pallas_call(
        _augment_kernel,
        out_shape=jax.ShapeDtypeStruct((B, C, howo_pad), x.dtype),
        grid=(B, n_j, n_k),
        in_specs=[
            pl.BlockSpec(memory_space=pltpu.MemorySpace.SMEM),        # params (3*B,) flat scalars
            pl.BlockSpec((1, C, tk), lambda b, j, k: (b, 0, k)),      # x      (B, C, HW_pad)   bf16
            pl.BlockSpec((1, tk, tn), lambda b, j, k: (b, k, j)),     # S      (B, HW_pad, HoWo_pad) bf16
            pl.BlockSpec((1, tn), lambda b, j, k: (0, j)),            # mask   (1, HoWo_pad)
        ],
        out_specs=pl.BlockSpec((1, C, tn), lambda b, j, k: (b, 0, j)),
        scratch_shapes=[pltpu.VMEM((C, tn), jnp.float32)],            # f32 accumulator
        compiler_params=pltpu.CompilerParams(
            dimension_semantics=("parallel", "parallel", "arbitrary"),
            vmem_limit_bytes=32 * 1024 * 1024,   # safe on v5e/v6e/v7x; far above actual use
        ),
        cost_estimate=cost,
    )(params_flat, x_flat, S_p, mask_p)

    return out[..., :HoWo].reshape(B, C, Ho, Wo)


# --------------------------------------------------------------------------------------
# Deterministic "random" parameter generation (mirrors the module's __init__/forward RNG)
# --------------------------------------------------------------------------------------
def _gen_param(rng, lo, hi):
    if lo == hi:
        return lo
    if isinstance(lo, int) and isinstance(hi, int):
        return int(rng.randint(lo, hi))
    return float(rng.uniform(lo, hi))


def _gen_rect(rng, img_h, img_w, min_h, min_w, max_h, max_w):
    rect_h = _gen_param(rng, min_h, max_h)
    rect_w = _gen_param(rng, min_w, max_w)
    max_x = img_w - rect_w
    max_y = img_h - rect_h
    x1 = _gen_param(rng, 0, max_x)
    x2 = min(x1 + rect_w, img_w)
    y1 = _gen_param(rng, 0, max_y)
    y2 = min(y1 + rect_h, img_h)
    return x1, y1, x2, y2


def _affine_inverse(angle_deg, tx, ty, sc, shear_deg, Hc, Wc):
    a = np.deg2rad(angle_deg)
    sh = np.deg2rad(shear_deg)
    cx, cy = (Wc - 1) / 2.0, (Hc - 1) / 2.0
    R = np.array([[np.cos(a), -np.sin(a)], [np.sin(a), np.cos(a)]])
    Shear = np.array([[1.0, np.tan(sh)], [0.0, 1.0]])
    A = sc * (R @ Shear)
    M = np.eye(3)
    M[:2, :2] = A
    M[0, 2] = cx - A[0, 0] * cx - A[0, 1] * cy + tx
    M[1, 2] = cy - A[1, 0] * cx - A[1, 1] * cy + ty
    return np.linalg.inv(M)


def build_augmentation(B, C, H, W, seed=0):
    rng = np.random.RandomState(seed)

    # --- flip (per sample, p=0.5 each) ---
    flip_h = rng.rand(B) < 0.5
    flip_v = rng.rand(B) < 0.5

    # --- crop: random_apply=1 over 5 RandomCrop ops, each p=0.9 ---
    crop_sizes = [
        (H - H // 32, W - W // 32),
        (H - H // 24, W - W // 24),
        (H - H // 20, W - W // 20),
        (H - H // 16, W - W // 16),
        (H - H // 12, W - W // 12),
    ]
    crop_idx = rng.randint(0, 5)
    apply_crop = rng.rand() < 0.9
    Ho, Wo = crop_sizes[crop_idx] if apply_crop else (H, W)
    crop_off = [(rng.randint(0, H - Ho + 1), rng.randint(0, W - Wo + 1)) for _ in range(B)]

    # --- geometry: RandomAffine or RandomThinPlateSpline (random_apply=1), p=0.9 per sample ---
    _geo_is_affine = rng.rand() < 0.5  # TODO(synk): TPS branch falls back to affine (see header)
    apply_geo = rng.rand(B) < 0.9
    affine_inv = []
    for b in range(B):
        ang = rng.uniform(-20.0, 20.0)
        tx = rng.uniform(-0.1, 0.1) * Wo
        ty = rng.uniform(-0.1, 0.1) * Ho
        sc = rng.uniform(0.8, 1.2)
        sh = rng.uniform(-5.0, 5.0)
        affine_inv.append(_affine_inverse(ang, tx, ty, sc, sh, Ho, Wo) if apply_geo[b] else None)

    # --- intensity: RandomContrast or RandomBrightness (random_apply=1), p=0.9 per sample ---
    int_is_contrast = rng.rand() < 0.5
    apply_int = rng.rand(B) < 0.9
    factors = rng.uniform(0.8, 1.2, size=B)
    params = np.zeros((B, 3), np.float32)
    for b in range(B):
        if apply_int[b]:
            if int_is_contrast:
                params[b] = [factors[b], 0.0, 1.0]          # x * c, clamp [0,1]
            else:
                params[b] = [1.0, factors[b] - 1.0, 1.0]    # x + (b-1), clamp [0,1]
        else:
            params[b] = [1.0, 0.0, 0.0]

    # --- custom: SameRoll or SameCutout (random_apply=1), p=0.9 (same across batch) ---
    custom_is_roll = rng.rand() < 0.5
    apply_custom = rng.rand() < 0.9
    shift_y = shift_x = 0
    mask2d = np.ones((Ho, Wo), np.float32)
    if apply_custom:
        if custom_is_roll:
            shift_y = rng.randint(int(Ho * 0.1), int(Ho * 0.9))
            shift_x = rng.randint(int(Wo * 0.1), int(Wo * 0.9))
        else:
            num_holes = _gen_param(rng, 4, 8)
            mn_h, mx_h = int(Ho * 0.05), int(Ho * 0.15)
            mn_w, mx_w = int(Wo * 0.05), int(Wo * 0.15)
            for _ in range(num_holes):
                x1, y1, x2, y2 = _gen_rect(rng, Ho, Wo, mn_h, mn_w, mx_h, mx_w)
                mask2d[y1:y2, x1:x2] = 0.0

    # --- fold flip + crop + affine + roll into one sampling matrix per sample ---
    # Each column has <= 4 nonzeros (bilinear taps).
    S = np.zeros((B, H * W, Ho * Wo), np.float32)
    for b in range(B):
        y0, x0 = crop_off[b]
        Minv = affine_inv[b]
        for i in range(Ho):
            for j in range(Wo):
                if apply_custom and custom_is_roll:
                    iw, jw = (i - shift_y) % Ho, (j - shift_x) % Wo
                else:
                    iw, jw = i, j
                if Minv is None:
                    xs, ys = float(jw), float(iw)
                else:
                    xs = Minv[0, 0] * jw + Minv[0, 1] * iw + Minv[0, 2]
                    ys = Minv[1, 0] * jw + Minv[1, 1] * iw + Minv[1, 2]
                xf, yf = int(np.floor(xs)), int(np.floor(ys))
                dy, dx = ys - yf, xs - xf
                for py, wy in ((yf, 1.0 - dy), (yf + 1, dy)):
                    for qx, wx in ((xf, 1.0 - dx), (xf + 1, dx)):
                        w = wy * wx
                        if w <= 0.0 or not (0 <= py < Ho and 0 <= qx < Wo):
                            continue  # zeros padding outside the (cropped) image
                        pi, qj = py + y0, qx + x0                 # crop offset (in flipped image)
                        si = H - 1 - pi if flip_v[b] else pi       # undo vertical flip
                        sj = W - 1 - qj if flip_h[b] else qj       # undo horizontal flip
                        S[b, si * W + sj, i * Wo + j] += w

    mask = mask2d.reshape(1, Ho * Wo)
    params_flat = params.reshape(-1).astype(np.float32)   # 1-D -> near-minimal SMEM padding
    return params_flat, S, mask, (Ho, Wo)


# --------------------------------------------------------------------------------------
if __name__ == "__main__":
    B, C, H, W = 2, 4, 16, 16
    key = jax.random.PRNGKey(0)
    x = jax.random.uniform(key, (B, C, H, W), dtype=jnp.float32)  # images in [0, 1]

    params_np, S_np, mask_np, out_hw = build_augmentation(B, C, H, W, seed=0)

    params_flat = jnp.asarray(params_np)
    S = jnp.asarray(S_np)
    mask = jnp.asarray(mask_np)

    out = run_kornia_augs(x, params_flat, S, mask, out_hw)
    jax.block_until_ready(out)
    assert out.shape == (B, C, out_hw[0], out_hw[1]), out.shape
    print("KERNEL_OK")
</pallas_src>

<mosaic_0001>
module attributes {stable_mosaic.version = 11 : i64} {
  func.func @_augment_kernel(%arg0: i32, %arg1: i32, %arg2: i32, %arg3: memref<6xf32, #tpu.memory_space<smem>>, %arg4: memref<1x4x256xbf16, #tpu.memory_space<vmem>>, %arg5: memref<1x256x256xbf16, #tpu.memory_space<vmem>>, %arg6: memref<1x256xf32, #tpu.memory_space<vmem>>, %arg7: memref<1x4x256xf32, #tpu.memory_space<vmem>>, %arg8: memref<4x256xf32, #tpu.memory_space<vmem>>) attributes {dimension_semantics = [#tpu.dimension_semantics<parallel>, #tpu.dimension_semantics<parallel>, #tpu.dimension_semantics<arbitrary>], iteration_bounds = array<i64: 2, 1, 1>, scalar_prefetch = 0 : i64, scratch_operands = 1 : i64, tpu.core_type = #tpu.core_type<tc>, window_params = [{transform_indices = @transform_0, window_bounds = array<i64: 6>}, {transform_indices = @transform_1, window_bounds = array<i64: 1, 4, 256>}, {transform_indices = @transform_2, window_bounds = array<i64: 1, 256, 256>}, {transform_indices = @transform_3, window_bounds = array<i64: 1, 256>}, {transform_indices = @transform_4, window_bounds = array<i64: 1, 4, 256>}]} {
    %c0_i32 = arith.constant 0 : i32
    %0 = arith.cmpi eq, %arg2, %c0_i32 : i32
    %1 = arith.extui %0 : i1 to i32
    %c0_i32_0 = arith.constant 0 : i32
    %2 = arith.cmpi ne, %1, %c0_i32_0 : i32
    scf.if %2 {
      %cst_12 = arith.constant 0.000000e+00 : f32
      %14 = vector.broadcast %cst_12 : f32 to vector<4x256xf32>
      %c0_13 = arith.constant 0 : index
      %c0_14 = arith.constant 0 : index
      %15 = vector.load %arg8[%c0_13, %c0_14] : memref<4x256xf32, #tpu.memory_space<vmem>>, vector<4x256xf32>
      tpu.vector_store %arg8[%c0_13, %c0_14], %14 {strides = array<i32>} : memref<4x256xf32, #tpu.memory_space<vmem>>, vector<4x256xf32>,
    } else {
    }
    %c0 = arith.constant 0 : index
    %c0_1 = arith.constant 0 : index
    %3 = vector.load %arg8[%c0, %c0_1] : memref<4x256xf32, #tpu.memory_space<vmem>>, vector<4x256xf32>
    %c0_2 = arith.constant 0 : index
    %c0_3 = arith.constant 0 : index
    %c0_4 = arith.constant 0 : index
    %4 = vector.load %arg4[%c0_2, %c0_3, %c0_4] : memref<1x4x256xbf16, #tpu.memory_space<vmem>>, vector<1x4x256xbf16>
    %5 = vector.shape_cast %4 : vector<1x4x256xbf16> to vector<4x256xbf16>
    %c0_5 = arith.constant 0 : index
    %c0_6 = arith.constant 0 : index
    %c0_7 = arith.constant 0 : index
    %6 = vector.load %arg5[%c0_5, %c0_6, %c0_7] : memref<1x256x256xbf16, #tpu.memory_space<vmem>>, vector<1x256x256xbf16>
    %7 = vector.shape_cast %6 : vector<1x256x256xbf16> to vector<256x256xbf16>
    %cst = arith.constant dense<0.000000e+00> : vector<4x256xf32>
    %8 = tpu.matmul %5, %7, %cst {dimension_numbers = #tpu.dot_dimension_numbers<[1], [0], [0], [1], [0, 0, 1, 1], [], []>} : vector<4x256xbf16>, vector<256x256xbf16>, vector<4x256xf32> -> vector<4x256xf32>
    %9 = arith.addf %3, %8 : vector<4x256xf32>
    %c0_8 = arith.constant 0 : index
    %c0_9 = arith.constant 0 : index
    %10 = vector.load %arg8[%c0_8, %c0_9] : memref<4x256xf32, #tpu.memory_space<vmem>>, vector<4x256xf32>
    tpu.vector_store %arg8[%c0_8, %c0_9], %9 {strides = array<i32>} : memref<4x256xf32, #tpu.memory_space<vmem>>, vector<4x256xf32>,
    %c0_i32_10 = arith.constant 0 : i32
    %11 = arith.cmpi eq, %arg2, %c0_i32_10 : i32
    %12 = arith.extui %11 : i1 to i32
    %c0_i32_11 = arith.constant 0 : i32
    %13 = arith.cmpi ne, %12, %c0_i32_11 : i32
    scf.if %13 {
      %c3_i32 = arith.constant 3 : i32
      %14 = arith.muli %c3_i32, %arg0 : i32
      %c0_i32_12 = arith.constant 0 : i32
      %15 = arith.addi %14, %c0_i32_12 : i32
      %16 = arith.index_cast %15 : i32 to index
      %17 = memref.load %arg3[%16] : memref<6xf32, #tpu.memory_space<smem>>
      %c3_i32_13 = arith.constant 3 : i32
      %18 = arith.muli %c3_i32_13, %arg0 : i32
      %c1_i32 = arith.constant 1 : i32
      %19 = arith.addi %18, %c1_i32 : i32
      %20 = arith.index_cast %19 : i32 to index
      %21 = memref.load %arg3[%20] : memref<6xf32, #tpu.memory_space<smem>>
      %c3_i32_14 = arith.constant 3 : i32
      %22 = arith.muli %c3_i32_14, %arg0 : i32
      %c2_i32 = arith.constant 2 : i32
      %23 = arith.addi %22, %c2_i32 : i32
      %24 = arith.index_cast %23 : i32 to index
      %25 = memref.load %arg3[%24] : memref<6xf32, #tpu.memory_space<smem>>
      %c0_15 = arith.constant 0 : index
      %c0_16 = arith.constant 0 : index
      %26 = vector.load %arg8[%c0_15, %c0_16] : memref<4x256xf32, #tpu.memory_space<vmem>>, vector<4x256xf32>
      %27 = vector.broadcast %17 : f32 to vector<4x256xf32>
      %28 = arith.mulf %26, %27 : vector<4x256xf32>
      %29 = vector.broadcast %21 : f32 to vector<4x256xf32>
      %30 = arith.addf %28, %29 : vector<4x256xf32>
      %cst_17 = arith.constant 5.000000e-01 : f32
      %31 = arith.cmpf ogt, %25, %cst_17 : f32
      %cst_18 = arith.constant 0.000000e+00 : f32
      %cst_19 = arith.constant 1.000000e+00 : f32
      %32 = vector.broadcast %cst_18 : f32 to vector<4x256xf32>
      %33 = arith.maximumf %32, %30 : vector<4x256xf32>
      %34 = vector.broadcast %cst_19 : f32 to vector<4x256xf32>
      %35 = arith.minimumf %34, %33 : vector<4x256xf32>
      %36 = arith.select %31, %35, %30 : vector<4x256xf32>
      %c0_20 = arith.constant 0 : index
      %c0_21 = arith.constant 0 : index
      %37 = vector.load %arg6[%c0_20, %c0_21] : memref<1x256xf32, #tpu.memory_space<vmem>>, vector<1x256xf32>
      %38 = vector.broadcast %37 : vector<1x256xf32> to vector<4x256xf32>
      %39 = arith.mulf %36, %38 : vector<4x256xf32>
      %c0_22 = arith.constant 0 : index
      %c0_23 = arith.constant 0 : index
      %c0_24 = arith.constant 0 : index
      %40 = vector.load %arg7[%c0_22, %c0_23, %c0_24] : memref<1x4x256xf32, #tpu.memory_space<vmem>>, vector<1x4x256xf32>
      %41 = vector.shape_cast %40 : vector<1x4x256xf32> to vector<4x256xf32>
      %42 = vector.shape_cast %39 : vector<4x256xf32> to vector<1x4x256xf32>
      tpu.vector_store %arg7[%c0_22, %c0_23, %c0_24], %42 {strides = array<i32>} : memref<1x4x256xf32, #tpu.memory_space<vmem>>, vector<1x4x256xf32>,
    } else {
    }
    return
  }
  func.func @transform_0(%arg0: i32, %arg1: i32, %arg2: i32) -> i32 {
    %c0_i32 = arith.constant 0 : i32
    %c0_i32_0 = arith.constant 0 : i32
    return %c0_i32 : i32
  }
  func.func @transform_1(%arg0: i32, %arg1: i32, %arg2: i32) -> (i32, i32, i32) {
    %c0_i32 = arith.constant 0 : i32
    %c0_i32_0 = arith.constant 0 : i32
    return %arg0, %c0_i32, %arg2 : i32, i32, i32
  }
  func.func @transform_2(%arg0: i32, %arg1: i32, %arg2: i32) -> (i32, i32, i32) {
    %c0_i32 = arith.constant 0 : i32
    return %arg0, %arg2, %arg1 : i32, i32, i32
  }
  func.func @transform_3(%arg0: i32, %arg1: i32, %arg2: i32) -> (i32, i32) {
    %c0_i32 = arith.constant 0 : i32
    %c0_i32_0 = arith.constant 0 : i32
    return %c0_i32, %arg1 : i32, i32
  }
  func.func @transform_4(%arg0: i32, %arg1: i32, %arg2: i32) -> (i32, i32, i32) {
    %c0_i32 = arith.constant 0 : i32
    %c0_i32_0 = arith.constant 0 : i32
    return %arg0, %c0_i32, %arg1 : i32, i32, i32
  }
}

</mosaic_0001>

<bundles_post_ra>
// kernel: tpu_custom_call.1
= control target key start
LH: loop header
LB: loop body
LE: loop exit
PB: predicated region body
PF: predicated region fallthrough
CT: control target
= control target key end

     0   :  { %s1487_s0 = inlined_call_operand.hbm [shape: f32[6], index: 0, kind: input, shape index: {}]   ;;  %s1488_s1 = inlined_call_operand.hbm [shape: bf16[2,4,256], index: 1, kind: input, shape index: {}]   ;;  %s1489_s2 = inlined_call_operand.hbm [shape: bf16[2,256,256], index: 2, kind: input, shape index: {}]   ;;  %s1490_s3 = inlined_call_operand.vmem [shape: f32[1,256], index: 3, kind: input, shape index: {}]   ;;  %s1491_s4 = inlined_call_operand.hbm [shape: f32[2,4,256], index: 4, kind: output, shape index: {}]  }
   0x1   :  { %1493 = sst [smem:[#allocation16_spill]] %s1487_s0 }
   0x2   :  { %1494 = sst [smem:[#allocation17_spill]] %s1488_s1 }
   0x3   :  { %9 = vsyncpa [#allocation6], 0 }
   0x4   :  { %10 = vsyncpa [#allocation4], 0 }
   0x5   :  { %12 = vsyncpa [#allocation4 + $0x1], 0 }
   0x6   :  { %13 = vsyncpa [#allocation9], 0 }
   0x7   :  { %15 = vsyncpa [#allocation9 + $0x1], 0 }
   0x8   :  { %16 = vsyncpa [#allocation5], 0 }
   0x9   :  { %18 = vsyncpa [#allocation5 + $0x1], 0  ;;  %s1242_s15 = smov 0   ;;  %s1244_s16 = smov 0  }
   0xa   :  { %s1246_s17 = smov 0   ;;  %s1248_s18 = smov 0  }
   0xb   :  { %s1250_s19 = smov 0   ;;  %s1252_s20 = smov 0  }
   0xc LB: > { %s782_s21 = sadd.s32 4294967295, %s1212_s20   ;;  %s783_s22 = sadd.s32 4294967294, %s1212_s20   ;;  %s1212_s20 = sphi %s1252_s20, %s24_s20   ;;  %s1208_s19 = sphi %s1250_s19, %s1511_s19   ;;  %s1204_s18 = sphi %s1248_s18, %s1510_s18   ;;  %s1200_s17 = sphi %s1246_s17, %s1509_s17   ;;  %s1196_s16 = sphi %s1244_s16, %s1508_s16   ;;  %s1192_s15 = sphi %s1242_s15, %s1507_s15  }
   0xd   : > { %p86_p0 = scmp.ne.s32.totalorder %s1196_s16, %s1192_s15  ;;  %p1276_p1 = scmp.eq.s32.totalorder %s782_s21, 0 }
   0xe   : > { %p1280_p2 = scmp.eq.s32.totalorder %s782_s21, 1  ;;  %p174_p3 = scmp.eq.s32.totalorder %s783_s22, 1 }
   0xf   : > { %p1286_p4 = por %p1276_p1, %p86_p0  ;;  %p784_p5 = scmp.ge.s32.totalorder %s1212_s20, 1 }
  0x10   : > { %p1291_p6 = por %p174_p3, %p86_p0  ;;  %p181_p7 = scmp.lt.s32.totalorder %s1212_s20, 3 }
  0x11   : > { %s1499_s0 = sld [smem:[#allocation16_spill]]  ;;  %s43_s5 = sadd.s32 1, %s1208_s19 }
  0x12   : > { %p1299_p8 = pnand %p784_p5, %p181_p7  ;;  %s73_s6 = sadd.s32 1, %s1200_s17 }
  0x13   : > { %p45_p12 = scmp.ge.s32.totalorder %s43_s5, 2  ;;  %s1214_s7 = smov [#allocation3]  }
  0x14   : > { %p977_p10 = pneg %p1299_p8  ;;  %p80_p13 = scmp.ne.s32.totalorder %s1200_s17, %s1196_s16 }
  0x15   : > { %s1513_s5 = smov (%p45_p12, %s43_s5), 0  ;;  %p81_p0 = scmp.eq.s32.totalorder %s1212_s20, 0 }
  0x16   : > { %p978_p11 = pnand %p977_p10, %p1276_p1  ;;  %1501 = sst [smem:[#allocation15_spill]] %s1513_s5 }
  0x17   : > { %s193_s29 = sshll.u32 %s1499_s0, 4  ;;  %s68_s8 = ssub.s32 %s1208_s19, %s1513_s5  ;;  %s194_s29 = int_to_ptr.hbm [resolvable:$true] %s193_s29 }
  0x18   : > { %980 = dma.hbm_to_smem (!%p978_p11), %s194_s29, 16, %s1214_s7, [#allocation6]  }
  0x19   : > { %p993_p3 = scmp.lt.s32.totalorder %s1212_s20, 2  ;;  %p71_p5 = scmp.eq.s32.totalorder %s68_s8, 0 }
  0x1a   : > { %p82_p7 = por %p81_p0, %p80_p13  ;;  %p1320_p9 = por %p1280_p2, %p80_p13 }
  0x1b   : > { %s1325_s10 = sand.u32 1, %s1200_s17   ;;  %s932_s13 = sshll.u32 %s1208_s19, 2 }
  0x1c   : > { %s1328_s11 = scalar_select %p71_p5, %s1200_s17, %s73_s6  }
  0x1d   : > { %s788_s12 = sshll.u32 %s1325_s10, 2  ;;  %s1503_s1 = sld [smem:[#allocation17_spill]] }
  0x1e   : > { %s216_s27 = scalar_lea.vmem [#allocation7], %s788_s12  ;;  %p1337_p2 = pnand %p993_p3, %p82_p7 }
  0x1f   : > { %s227_s24 = sshll.u32 %s216_s27, 4  ;;  %s791_s6 = sshll.u32 %s1325_s10, 8  ;;  %s228_s24 = int_to_ptr.vmem [resolvable:$true] %s227_s24 }
  0x20   : > { %s213_s7 = scalar_lea.sflag [#allocation4], %s1325_s10  ;;  %s933_s8 = sshll.u32 %s1208_s19, 8 }
  0x21   : > { %s238_s14 = scalar_lea.vmem [#allocation8], %s791_s6  ;;  %s235_s0 = scalar_lea.sflag [#allocation9], %s1325_s10 }
  0x22   : > { %s1216_s5 = smov 8  }
  0x23   : > { %s223_s22 = scalar_lea.hbm %s1503_s1, %s932_s13  ;;  %s251_s13 = sshll.u32 %s238_s14, 4  ;;  %s252_s13 = int_to_ptr.vmem [resolvable:$true] %s251_s13 }
  0x24   : > { %s225_s28 = sshll.u32 %s223_s22, 4  ;;  %s248_s22 = scalar_lea.hbm %s1489_s2, %s933_s8  ;;  %s226_s28 = int_to_ptr.hbm [resolvable:$true] %s225_s28 }
  0x25   : > { %984 = dma.hbm_to_vmem [thread:$0]  (!%p1337_p2), %s226_s28, 64, %s228_s24, %s213_s7  }
  0x26   : > { %s249_s27 = sshll.u32 %s248_s22, 4  ;;  %s1215_s1 = smov 128   ;;  %s250_s27 = int_to_ptr.hbm [resolvable:$true] %s249_s27 }
  0x27   : > { %987 = dma.hbm_to_vmem [thread:$0]  (!%p1337_p2), %s250_s27, 4096, %s252_s13, %s235_s0, %s1215_s1, %s1215_s1, %s1216_s5  }
  0x28   : > { %263 = sbr.rel (%p1299_p8) target bundleno = 242 (0xf2), region = 36 }
  0x2d   : > { %1175 = dma.done.wait (%p1276_p1), [#allocation6], 16  }
  0x2e   : > { %1177 = vsyncadd (%p1276_p1), [#allocation6], 4294967280  ;;  %s1359_s24 = sand.u32 1, %s1196_s16  }
  0x2f   : > { %s796_s10 = sshll.u32 %s1359_s24, 2  ;;  %s271_s28 = scalar_lea.sflag [#allocation4], %s1359_s24 }
  0x30   : > { %s1363_s6 = scalar_lea.vmem [#allocation7], %s796_s10 }
  0x31   : > { %1179 = dma.done.wait (%p1286_p4), %s271_s28, 64  }
  0x32   : > { %1181 = vsyncadd (%p1286_p4), %s271_s28, 4294967232  ;;  %s797_s0 = sshll.u32 %s1359_s24, 8  ;;  %s281_s1 = scalar_lea.sflag [#allocation9], %s1359_s24 }
  0x33   : > { %s1371_s23 = scalar_lea.vmem [#allocation8], %s797_s0 }
  0x34   : > { %1183 = dma.done.wait (%p1286_p4), %s281_s1, 4096  }
  0x35   : > { %1185 = vsyncadd (%p1286_p4), %s281_s1, 4294963200 }
  0x36   : > { %290 = sfence }
  0x37   : > { %v857_v0 = vld [vmem:[%s1371_s23 + $0x70] sm:$0xf]  ;;  %v949_v1 = vld [vmem:[%s1371_s23 + $0x74] sm:$0xf0]  ;;  %v948_v5 = vld [vmem:[%s1371_s23 + $0x74] sm:$0xf] }
  0x38   : > { %v921_v2 = vld [vmem:[%s1371_s23 + $0xf0] sm:$0xf]  ;;  %v858_v3 = vor.u32 %v949_v1, %v857_v0  ;;  %v965_v4 = vld [vmem:[%s1371_s23 + $0xf4] sm:$0xf0]  ;;  %v859_v6 = vld [vmem:[%s1371_s23 + $0x78] sm:$0xf0] }
  0x39   : > { %v922_v7 = vor.u32 %v965_v4, %v921_v2  ;;  %v862_v8 = vor.u32 %v948_v5, %v859_v6  ;;  %v964_v9 = vld [vmem:[%s1371_s23 + $0xf4] sm:$0xf]  ;;  %v923_v10 = vld [vmem:[%s1371_s23 + $0xf8] sm:$0xf0]  ;;  %v849_v11 = vld [vmem:[%s1371_s23 + $0x60] sm:$0xf] }
  0x3a   : > { %534 = vmatpush.bf16.msra.mxu0 %v858_v3  ;;  %v926_v12 = vor.u32 %v964_v9, %v923_v10  ;;  %v947_v13 = vld [vmem:[%s1371_s23 + $0x64] sm:$0xf0]  ;;  %v913_v14 = vld [vmem:[%s1371_s23 + $0xe0] sm:$0xf]  ;;  %v946_v18 = vld [vmem:[%s1371_s23 + $0x64] sm:$0xf] }
  0x3b   : > { %v963_v15 = vld [vmem:[%s1371_s23 + $0xe4] sm:$0xf0]  ;;  %547 = vmatpush.bf16.msra.mxu1 %v922_v7  ;;  %560 = vmatpush.bf16.msra.mxu2 %v862_v8  ;;  %v850_v16 = vor.u32 %v947_v13, %v849_v11  ;;  %v851_v19 = vld [vmem:[%s1371_s23 + $0x68] sm:$0xf0]  ;;  %v962_v20 = vld [vmem:[%s1371_s23 + $0xe4] sm:$0xf] }
  0x3c   : > { %v914_v17 = vor.u32 %v963_v15, %v913_v14  ;;  %573 = vmatpush.bf16.msra.mxu3 %v926_v12  ;;  %v854_v21 = vor.u32 %v946_v18, %v851_v19  ;;  %v915_v22 = vld [vmem:[%s1371_s23 + $0xe8] sm:$0xf0]  ;;  %v841_v23 = vld [vmem:[%s1371_s23 + $0x50] sm:$0xf]  ;;  %v945_v24 = vld [vmem:[%s1371_s23 + $0x54] sm:$0xf0] }
  0x3d   : > { %v918_v25 = vor.u32 %v962_v20, %v915_v22  ;;  %v905_v26 = vld [vmem:[%s1371_s23 + $0xd0] sm:$0xf]  ;;  %v961_v27 = vld [vmem:[%s1371_s23 + $0xd4] sm:$0xf0]  ;;  %v944_v28 = vld [vmem:[%s1371_s23 + $0x54] sm:$0xf]  ;;  %v842_v29 = vor.u32 %v945_v24, %v841_v23 }
  0x3e   : > { %535 = vmatpush.bf16.msra.mxu0 %v850_v16  ;;  %v843_v30 = vld [vmem:[%s1371_s23 + $0x58] sm:$0xf0]  ;;  %v960_v31 = vld [vmem:[%s1371_s23 + $0xd4] sm:$0xf]  ;;  %v906_v33 = vor.u32 %v961_v27, %v905_v26  ;;  %v833_v35 = vld [vmem:[%s1371_s23 + $0x40] sm:$0xf] }
  0x3f   : > { %v907_v32 = vld [vmem:[%s1371_s23 + $0xd8] sm:$0xf0]  ;;  %548 = vmatpush.bf16.msra.mxu1 %v914_v17  ;;  %561 = vmatpush.bf16.msra.mxu2 %v854_v21  ;;  %v846_v34 = vor.u32 %v944_v28, %v843_v30  ;;  %v943_v36 = vld [vmem:[%s1371_s23 + $0x44] sm:$0xf0]  ;;  %v897_v37 = vld [vmem:[%s1371_s23 + $0xc0] sm:$0xf] }
  0x40   : > { %574 = vmatpush.bf16.msra.mxu3 %v918_v25  ;;  %v910_v38 = vor.u32 %v960_v31, %v907_v32  ;;  %v959_v39 = vld [vmem:[%s1371_s23 + $0xc4] sm:$0xf0]  ;;  %v942_v40 = vld [vmem:[%s1371_s23 + $0x44] sm:$0xf]  ;;  %v835_v41 = vld [vmem:[%s1371_s23 + $0x48] sm:$0xf0]  ;;  %v834_v44 = vor.u32 %v943_v36, %v833_v35 }
  0x41   : > { %v958_v42 = vld [vmem:[%s1371_s23 + $0xc4] sm:$0xf]  ;;  %v899_v43 = vld [vmem:[%s1371_s23 + $0xc8] sm:$0xf0]  ;;  %v898_v45 = vor.u32 %v959_v39, %v897_v37  ;;  %v838_v46 = vor.u32 %v942_v40, %v835_v41  ;;  %v825_v47 = vld [vmem:[%s1371_s23 + $0x30] sm:$0xf] }
  0x42   : > { %536 = vmatpush.bf16.msra.mxu0 %v842_v29  ;;  %v941_v48 = vld [vmem:[%s1371_s23 + $0x34] sm:$0xf0]  ;;  %v889_v49 = vld [vmem:[%s1371_s23 + $0xb0] sm:$0xf]  ;;  %v902_v50 = vor.u32 %v958_v42, %v899_v43  ;;  %v940_v52 = vld [vmem:[%s1371_s23 + $0x34] sm:$0xf] }
  0x43   : > { %549 = vmatpush.bf16.msra.mxu1 %v906_v33  ;;  %562 = vmatpush.bf16.msra.mxu2 %v846_v34  ;;  %v957_v51 = vld [vmem:[%s1371_s23 + $0xb4] sm:$0xf0]  ;;  %v827_v53 = vld [vmem:[%s1371_s23 + $0x38] sm:$0xf0]  ;;  %v956_v54 = vld [vmem:[%s1371_s23 + $0xb4] sm:$0xf]  ;;  %v826_v56 = vor.u32 %v941_v48, %v825_v47 }
  0x44   : > { %575 = vmatpush.bf16.msra.mxu3 %v910_v38  ;;  %v891_v55 = vld [vmem:[%s1371_s23 + $0xb8] sm:$0xf0]  ;;  %v890_v57 = vor.u32 %v957_v51, %v889_v49  ;;  %v830_v58 = vor.u32 %v940_v52, %v827_v53  ;;  %v817_v59 = vld [vmem:[%s1371_s23 + $0x20] sm:$0xf]  ;;  %v939_v60 = vld [vmem:[%s1371_s23 + $0x24] sm:$0xf0] }
  0x45   : > { %v881_v61 = vld [vmem:[%s1371_s23 + $0xa0] sm:$0xf]  ;;  %v894_v62 = vor.u32 %v956_v54, %v891_v55  ;;  %v955_v63 = vld [vmem:[%s1371_s23 + $0xa4] sm:$0xf0]  ;;  %v938_v0 = vld [vmem:[%s1371_s23 + $0x24] sm:$0xf]  ;;  %v818_v4 = vor.u32 %v939_v60, %v817_v59 }
  0x46   : > { %537 = vmatpush.bf16.msra.mxu0 %v834_v44  ;;  %v819_v1 = vld [vmem:[%s1371_s23 + $0x28] sm:$0xf0]  ;;  %v954_v2 = vld [vmem:[%s1371_s23 + $0xa4] sm:$0xf]  ;;  %v809_v5 = vld [vmem:[%s1371_s23 + $0x10] sm:$0xf]  ;;  %v882_v6 = vor.u32 %v955_v63, %v881_v61 }
  0x47   : > { %550 = vmatpush.bf16.msra.mxu1 %v898_v45  ;;  %563 = vmatpush.bf16.msra.mxu2 %v838_v46  ;;  %v883_v3 = vld [vmem:[%s1371_s23 + $0xa8] sm:$0xf0]  ;;  %v822_v7 = vor.u32 %v938_v0, %v819_v1  ;;  %v937_v8 = vld [vmem:[%s1371_s23 + $0x14] sm:$0xf0]  ;;  %v873_v9 = vld [vmem:[%s1371_s23 + $0x90] sm:$0xf] }
  0x48   : > { %576 = vmatpush.bf16.msra.mxu3 %v902_v50  ;;  %v953_v10 = vld [vmem:[%s1371_s23 + $0x94] sm:$0xf0]  ;;  %v886_v11 = vor.u32 %v954_v2, %v883_v3  ;;  %v936_v12 = vld [vmem:[%s1371_s23 + $0x14] sm:$0xf]  ;;  %v811_v13 = vld [vmem:[%s1371_s23 + $0x18] sm:$0xf0]  ;;  %v810_v17 = vor.u32 %v937_v8, %v809_v5 }
  0x49   : > { %v335_v14 = vld [vmem:[%s1363_s6] sm:$0xf]  ;;  %v952_v15 = vld [vmem:[%s1371_s23 + $0x94] sm:$0xf]  ;;  %v874_v18 = vor.u32 %v953_v10, %v873_v9  ;;  %v814_v19 = vor.u32 %v936_v12, %v811_v13  ;;  %v801_v20 = vld [vmem:[%s1371_s23] sm:$0xf] }
  0x4a   : > { %538 = vmatpush.bf16.msra.mxu0 %v826_v56  ;;  %v875_v16 = vld [vmem:[%s1371_s23 + $0x98] sm:$0xf0]  ;;  %369 = vst [vmem:[#allocation1] ss:$4 sm:$0xff] %v335_v14  ;;  %v935_v21 = vld [vmem:[%s1371_s23 + $0x4] sm:$0xf0] }
  0x4b   : > { %551 = vmatpush.bf16.msra.mxu1 %v890_v57  ;;  %564 = vmatpush.bf16.msra.mxu2 %v830_v58  ;;  %v865_v22 = vld [vmem:[%s1371_s23 + $0x80] sm:$0xf]  ;;  %v878_v23 = vor.u32 %v952_v15, %v875_v16  ;;  %v951_v24 = vld [vmem:[%s1371_s23 + $0x84] sm:$0xf0]  ;;  %v934_v25 = vld [vmem:[%s1371_s23 + $0x4] sm:$0xf]  ;;  %v802_v29 = vor.u32 %v935_v21, %v801_v20 }
  0x4c   : > { %577 = vmatpush.bf16.msra.mxu3 %v894_v62  ;;  %v803_v26 = vld [vmem:[%s1371_s23 + $0x8] sm:$0xf0]  ;;  %v950_v27 = vld [vmem:[%s1371_s23 + $0x84] sm:$0xf]  ;;  %v866_v30 = vor.u32 %v951_v24, %v865_v22  ;;  %s597_s25 = smul.u32 3, %s1204_s18  ;;  %vm589_vm0 = vcmask 1043456  }
  0x4d   : > { %v867_v28 = vld [vmem:[%s1371_s23 + $0x88] sm:$0xf0]  ;;  %v806_v31 = vor.u32 %v934_v25, %v803_v26  ;;  %v615_v43 = vld [vmem:[%s1490_s3] sm:$0x3]  ;;  %s798_s21 = sshll.u32 %s1359_s24, 3  ;;  %s966_s22 = sshll.u32 %s1204_s18, 3 }
  0x4e   : > { %539 = vmatpush.bf16.msra.mxu0 %v818_v4  ;;  %v870_v32 = vor.u32 %v950_v27, %v867_v28  ;;  %s601_s30 = sadd.s32 2, %s597_s25  ;;  %s599_s29 = sadd.s32 1, %s597_s25  ;;  %v618_v46 = vperm.slane %v615_v43, 1  ;;  %v617_v54 = vperm.slane %v615_v43, 0 }
  0x4f   : > { %552 = vmatpush.bf16.msra.mxu1 %v882_v6  ;;  %565 = vmatpush.bf16.msra.mxu2 %v822_v7  ;;  %s602_s5 = sld [smem:[#allocation3 + %s601_s30]]  ;;  %s638_s28 = scalar_lea.hbm %s1491_s4, %s966_s22 }
  0x50   : > { %578 = vmatpush.bf16.msra.mxu3 %v886_v11  ;;  %s598_s7 = sld [smem:[#allocation3 + %s597_s25]]  ;;  %v619_v55 = vrot.slane %v618_v46, 4  ;;  %s319_s6 = scalar_lea.vmem [#allocation10], %s798_s21 }
  0x51   : > { %v370_v33 = vld.sshfl [vmem:[#allocation1] sm:$0xff pattern:$0x73625140]  ;;  %v371_v34 = vld.sshfl [vmem:[#allocation1 + $0x8] sm:$0xff pattern:$0x73625140] }
  0x52   : > { %540 = vmatpush.bf16.msra.mxu0 %v810_v17  ;;  %s600_s8 = sld [smem:[#allocation3 + %s599_s29]]  ;;  %v620_v58 = vsel %vm589_vm0, %v617_v54, %v619_v55  ;;  %s640_s0 = sshll.u32 %s319_s6, 4  ;;  %s641_s0 = int_to_ptr.vmem [resolvable:$true] %s640_s0 }
  0x53   : > { %553 = vmatpush.bf16.msra.mxu1 %v874_v18  ;;  %566 = vmatpush.bf16.msra.mxu2 %v814_v19  ;;  %s642_s18 = sshll.u32 %s638_s28, 4  ;;  %s625_s1 = scalar_lea.sflag [#allocation5], %s1359_s24  ;;  %s643_s18 = int_to_ptr.hbm [resolvable:$true] %s642_s18 }
  0x54   : > { %579 = vmatpush.bf16.msra.mxu3 %v878_v23  ;;  %s1136_s23 = sshra.s32 %s643_s18, 4  ;;  %s1142_s29 = scalar_lea.hbm %s1491_s4, 16  ;;  %s1137_s23 = int_to_ptr.hbm [resolvable:$true] %s1136_s23 }
  0x55   : > { %p608_p1 = scmp.gt.f32.partialorder %s602_s5, 0.5  ;;  %s1138_s25 = scalar_lea.hbm %s1137_s23, 8 }
  0x56   : > { %541 = vmatpush.bf16.msra.mxu0 %v802_v29  ;;  %v604_v45 = vstv %s598_s7  ;;  %p1139_p4 = scmp.ne.s32.totalorder %s1137_s23, %s1138_s25  ;;  %p1143_p11 = scmp.lt.s32.totalorder %s1137_s23, %s1491_s4 }
  0x57   : > { %554 = vmatpush.bf16.msra.mxu1 %v866_v30  ;;  %567 = vmatpush.bf16.msra.mxu2 %v806_v31  ;;  %s611_s12 = scalar_select %p608_p1, 1, 0 }
  0x58   : > { %580 = vmatpush.bf16.msra.mxu3 %v870_v32  ;;  %v606_v48 = vstv %s600_s8  ;;  %p1140_p8 = pnand %p1139_p4, %p1320_p9  ;;  %p1144_p12 = scmp.lt.s32.totalorder %s1142_s29, %s1138_s25 }
  0x59   : > { %542 = vmatmul.bf16.vlgmr.msra.gmra.mxu0 %v370_v33  ;;  %v612_v53 = vstv %s611_s12 }
  0x5a   : > { %555 = vmatmul.bf16.vlgmr.msra.gmra.mxu1 %v371_v34  ;;  %568 = vmatmul.bf16.vlgmr.msra.gmra.mxu2 %v370_v33  ;;  %vm613_vm1 = vcmp.eq.s32.totalorder %v612_v53, 1  ;;  %p1141_p10 = pneg %p1140_p8  ;;  %p1145_p13 = por %p1144_p12, %p1143_p11 }
  0x5b   : > { %581 = vmatmul.bf16.vlgmr.msra.gmra.mxu3 %v371_v34 }
  0x5c   : > { %p1146_p0 = pnand %p1145_p13, %p1141_p10 }
  0xd6   : > { %v543_v35 = vpop.f32.mrf.mxu0 }
  0xd7   : > { %v556_v36 = vpop.f32.mrf.mxu1 }
  0xd8   : > { %v557_v40 = vadd.f32 %v556_v36, %v543_v35 }
  0xdd   : > { %v569_v37 = vpop.f32.mrf.mxu2 }
  0xde   : > { %v582_v38 = vpop.f32.mrf.mxu3  ;;  %v545_v39 = vpop.f32.mrf.mxu0 }
  0xdf   : > { %v583_v41 = vadd.f32 %v582_v38, %v569_v37  ;;  %v558_v42 = vpop.f32.mrf.mxu1 }
  0xe1   : > { %v588_v44 = vrot.slane %v583_v41, 4 }
  0xe3   : > { %v590_v47 = vsel %vm589_vm0, %v557_v40, %v588_v44 }
  0xe4   : > { %v605_v49 = vmul.f32 %v604_v45, %v590_v47 }
  0xe5   : > { %v571_v50 = vpop.f32.mrf.mxu2 }
  0xe6   : > { %v607_v51 = vadd.f32 %v606_v48, %v605_v49  ;;  %v584_v52 = vpop.f32.mrf.mxu3 }
  0xe8   : > { %v609_v56 = vmax.f32 %v607_v51, 0.0 }
  0xea   : > { %v610_v57 = vmin.f32 %v609_v56, 1.0 }
  0xec   : > { %v614_v59 = vsel %vm613_vm1, %v610_v57, %v607_v51 }
  0xed   : > { %v622_v60 = vmul.f32 %v620_v58, %v614_v59 }
  0xef   : > { %623 = vst [vmem:[%s319_s6] sm:$0xff] %v622_v60 }
  0xf0   : > { %1149 = shalt.err (!%p1146_p0)
}
  0xf1   : > { %975 = dma.vmem_to_hbm [thread:$0]  (%p1320_p9), %s641_s0, 128, %s643_s18, %s625_s1  }
  0xf2 PF: > { %s654_s24 = sand.u32 1, %s1192_s15   ;;  %p1505_p3 = scmp.ge.s32.totalorder %s1212_s20, 2 }
  0xf3   : > { %s655_s14 = scalar_lea.sflag [#allocation5], %s654_s24 }
  0xf4   : > { %p989_p5 = pnand %p1505_p3, %p1291_p6 }
  0xf6   : > { %p990_p7 = pneg %p989_p5 }
  0xf8   : > { %1187 = dma.done.wait (%p990_p7), %s655_s14, 128  }
  0xf9   : > { %1189 = vsyncadd (%p990_p7), %s655_s14, 4294967168  ;;  %s24_s20 = sadd.s32 1, %s1212_s20   ;;  %s1506_s9 = sld [smem:[#allocation15_spill]] }
  0xfa   : > { %p21_p2 = scmp.ge.s32.totalorder %s24_s20, 4   ;;  %s1507_s15 = smov %s1196_s16 }
  0xfb   : > { %s1508_s16 = smov %s1200_s17  ;;  %s1509_s17 = smov %s1328_s11 }
  0xfc   : > { %s1510_s18 = smov %s1208_s19  ;;  %23 = sbr.rel (!%p21_p2) target bundleno = 12 (0xc), region = 110 }
  0xff   : > { %s1511_s19 = smov %s1506_s9 }
 0x101   :  { %661 = vsyncpa [#allocation4], 1 }
 0x102   :  { %663 = vsyncpa [#allocation4 + $0x1], 1 }
 0x103   :  { %664 = vsyncpa [#allocation9], 1 }
 0x104   :  { %666 = vsyncpa [#allocation9 + $0x1], 1 }
 0x105   :  { %667 = vsyncpa [#allocation5], 1 }
 0x106   :  { %669 = vsyncpa [#allocation5 + $0x1], 1 }
 0x107   :  { %670 = vsyncpa [#allocation6], 1 }
 0x108   :  { %672 = vsyncpa [#allocation6 + $0x1], 1 }

</bundles_post_ra>
